<compile_context>
chip_gen: v5e
topology: v5e:2x2
jax: 0.10.0
libtpu: 0.0.40
codegen_flags: <defaults>
</compile_context>

<pallas_src>
import functools

import jax
import jax.numpy as jnp
from jax.experimental import pallas as pl
from jax.experimental.pallas import tpu as pltpu


def _round_up(x, m):
    return ((x + m - 1) // m) * m


def _vmem_capacity_bytes():
    """Physical VMEM per TensorCore; conservative v7x fallback (64 MiB)."""
    try:
        info = pltpu.get_tpu_info()
        cap = getattr(info, "vmem_capacity_bytes", None)
        if cap:
            return int(cap)
    except Exception:
        pass
    return 64 << 20


def _choose_tile_n(d, c, *, out_rows, feat_rows, vmem_limit_bytes):
    """Lane-dense (multiple-of-128) class-dim tile size.

    Budgets ALL double-buffered per-tile bytes (int8 W column + f32 scale +
    f32 bias + f32 output rows) plus the resident bf16 feat against the
    generation-aware VMEM limit, then caps the tile so the grid keeps at
    least ~4 pipeline steps when the class dim allows it.
    """
    cp_min = _round_up(c, 128)
    # Double-buffered bytes per streamed class column.
    per_col = 2 * (d * 1 + 4 + 4 + out_rows * 4)
    feat_bytes = 2 * feat_rows * d * 2  # resident bf16 feat (count 2 buffers)
    budget = int(vmem_limit_bytes * 0.75) - feat_bytes
    t = max(128, (budget // per_col) // 128 * 128)
    # Keep the W stream pipelined: aim for >= 4 grid steps (or as many
    # 128-wide steps as C allows) instead of one giant un-overlapped step.
    n128 = cp_min // 128
    if n128 > 1:
        t = min(t, max(128, (n128 // min(4, n128)) * 128))
    return min(t, cp_min)


def _fc_head_kernel(feat_ref, w_ref, scale_ref, bias_ref, o_ref):
    # feat_ref:  [Bp_in, D]    bf16, resident across the C-tile grid
    # w_ref:     [D, Tn]       int8 fused-weight tile (BN affine pre-folded)
    # scale_ref: [1, Tn]       f32 per-class dequant scale
    # bias_ref:  [1, Tn]       f32 fused bias tile (BN shift pre-folded)
    # o_ref:     [Bp_out, Tn]  f32 logits tile (Bp_out <= Bp_in)
    bp_out = o_ref.shape[0]
    acc = jnp.dot(feat_ref[...], w_ref[...].astype(jnp.bfloat16),
                  preferred_element_type=jnp.float32)
    # Per-class dequant scale + fused bias in the epilogue (VPU slot has
    # plenty of slack; the kernel is HBM-bound on the W stream).
    o_ref[...] = acc[:bp_out, :] * scale_ref[...] + bias_ref[...]


@functools.partial(jax.jit,
                   static_argnames=("num_classes", "tile_n",
                                    "vmem_limit_bytes"))
def _fc_head_forward_pallas(feat, w_q, scale, bias, *, num_classes, tile_n,
                            vmem_limit_bytes):
    """Eval-mode FcHead forward via Pallas: logits = feat @ W_fused + b_fused."""
    B, D = feat.shape
    Dw, Cp = w_q.shape
    assert Dw == D and Cp % tile_n == 0 and tile_n % 128 == 0

    # feat padded to 16 rows (bf16 sublane packing); output rows padded only
    # to 8 (f32 sublane minimum) to trim padded writeback.
    bp_in = _round_up(B, 16)
    bp_out = _round_up(B, 8)
    feat_p = feat.astype(jnp.bfloat16)
    if bp_in != B:
        feat_p = jnp.pad(feat_p, ((0, bp_in - B), (0, 0)))

    grid = (Cp // tile_n,)
    cost = pl.CostEstimate(
        flops=2 * bp_in * D * Cp,
        transcendentals=0,
        bytes_accessed=(w_q.size                 # int8 W stream
                        + feat_p.size * 2        # bf16 feat
                        + scale.size * 4 + bias.size * 4
                        + bp_out * Cp * 4),      # f32 logits writeback
    )

    out = pl.pallas_call(
        _fc_head_kernel,
        out_shape=jax.ShapeDtypeStruct((bp_out, Cp), jnp.float32),
        grid_spec=pltpu.PrefetchScalarGridSpec(
            num_scalar_prefetch=0,
            grid=grid,
            in_specs=[
                pl.BlockSpec((bp_in, D), lambda j: (0, 0)),      # feat (resident)
                pl.BlockSpec((D, tile_n), lambda j: (0, j)),     # int8 W stream
                pl.BlockSpec((1, tile_n), lambda j: (0, j)),     # scale tile
                pl.BlockSpec((1, tile_n), lambda j: (0, j)),     # bias tile
            ],
            out_specs=pl.BlockSpec((bp_out, tile_n), lambda j: (0, j)),
        ),
        compiler_params=pltpu.CompilerParams(
            # TODO(synk): if an xprof trace on v7x shows a single TensorCore
            # handling all C tiles, switch this axis to pltpu.CORE_PARALLEL
            # (or pl.core_map over create_tensorcore_mesh) to split the
            # W-bandwidth across both TCs.
            dimension_semantics=("parallel",),
            vmem_limit_bytes=vmem_limit_bytes,
        ),
        cost_estimate=cost,
    )(feat_p, w_q, scale, bias)

    return out[:B, :num_classes]


def fc_head_forward(feat, params):
    """Dispatch: Pallas streamed GEMM for real heads, plain XLA for tiny ones."""
    if params["use_pallas"]:
        return _fc_head_forward_pallas(
            feat, params["w_q"], params["scale_pad"], params["bias_pad"],
            num_classes=params["num_classes"], tile_n=params["tile_n"],
            vmem_limit_bytes=params["vmem_limit_bytes"])
    # Tiny head: one grid step = no pipelining; launch overhead beats XLA.
    return feat @ params["w_fused"] + params["bias_fused"]


def make_fc_head_params(key, in_feats, num_classes, *, ifbnneck=True, eps=1e-5):
    """Mirror FcHead.__init__ (eval mode) and fold BN into fc.

    Returns f32 fused weight [D, C] and fused bias [C].
    """
    # weights_init_classifier: Linear weight ~ Normal(0, 0.001), bias = 0
    w_pt = 0.001 * jax.random.normal(key, (num_classes, in_feats), jnp.float32)
    w = w_pt.T  # [D, C]

    if ifbnneck:
        # BatchNorm1d (weights_init_kaiming): gamma=1, beta=0; running stats 0/1.
        gamma = jnp.ones((in_feats,), jnp.float32)
        beta = jnp.zeros((in_feats,), jnp.float32)
        running_mean = jnp.zeros((in_feats,), jnp.float32)
        running_var = jnp.ones((in_feats,), jnp.float32)
        scale = gamma / jnp.sqrt(running_var + eps)
        shift = beta - running_mean * scale
        bias = jnp.zeros((num_classes,), jnp.float32)  # fc has bias=False
    else:
        scale = jnp.ones((in_feats,), jnp.float32)
        shift = jnp.zeros((in_feats,), jnp.float32)
        bias = jnp.zeros((num_classes,), jnp.float32)  # init.constant_(bias, 0)

    # Fold BN eval affine:  (x*scale + shift) @ W + b
    #                    =  x @ (scale[:,None] * W) + (shift @ W + b)
    w_fused = scale[:, None] * w
    bias_fused = shift @ w + bias
    return w_fused, bias_fused


def pack_fc_head_params(w_fused, bias_fused, *, num_classes=None, batch_hint=16):
    """One-time host prep: per-class int8 quantization, class-dim padding,
    generation-aware tile / VMEM-limit selection."""
    D, C = w_fused.shape
    if num_classes is None:
        num_classes = C

    out_rows = _round_up(batch_hint, 8)
    feat_rows = _round_up(batch_hint, 16)
    vmem_cap = _vmem_capacity_bytes()
    vmem_limit = (vmem_cap * 3) // 4            # explicit scoped-VMEM limit

    tile_n = _choose_tile_n(D, C, out_rows=out_rows, feat_rows=feat_rows,
                            vmem_limit_bytes=vmem_limit)
    cp = _round_up(C, tile_n)
    use_pallas = (cp // tile_n) >= 2            # need >= 2 steps for pipelining

    # Per-class symmetric int8 quantization of the fused weight; the f32
    # dequant scale is applied to the accumulator in the kernel epilogue.
    absmax = jnp.max(jnp.abs(w_fused), axis=0)
    scale = jnp.where(absmax > 0, absmax, 1.0) / 127.0
    w_q = jnp.clip(jnp.round(w_fused / scale[None, :]), -127, 127).astype(jnp.int8)

    w_q_pad = jnp.pad(w_q, ((0, 0), (0, cp - C)))
    scale_pad = jnp.pad(scale, (0, cp - C), constant_values=1.0)
    bias_pad = jnp.pad(bias_fused, (0, cp - C))

    return dict(
        use_pallas=use_pallas,
        num_classes=num_classes,
        tile_n=int(tile_n),
        vmem_limit_bytes=int(vmem_limit),
        w_q=w_q_pad,                                           # int8 [D, Cp]
        scale_pad=scale_pad.reshape(1, cp).astype(jnp.float32),  # f32 [1, Cp]
        bias_pad=bias_pad.reshape(1, cp).astype(jnp.float32),    # f32 [1, Cp]
        # Kept for the tiny-head XLA fallback / reference use.
        w_fused=w_fused,
        bias_fused=bias_fused,
    )


if __name__ == "__main__":
    key = jax.random.PRNGKey(0)
    k_feat, k_param, k_feat2, k_param2 = jax.random.split(key, 4)

    # --- Pallas path: a realistic (still small) classifier head ---
    B, D, C = 8, 128, 1000
    feat = jax.random.normal(k_feat, (B, D), jnp.float32)

    w_fused, bias_fused = make_fc_head_params(k_param, D, C, ifbnneck=True)
    params = pack_fc_head_params(w_fused, bias_fused, num_classes=C,
                                 batch_hint=B)
    assert params["use_pallas"], "demo head should take the Pallas path"

    logits = fc_head_forward(feat, params)
    jax.block_until_ready(logits)
    assert logits.shape == (B, C)

    # Reference vs. the dequantized int8 weights (isolates bf16-feat rounding).
    w_deq = params["w_q"][:, :C].astype(jnp.float32) * params["scale_pad"][0, :C]
    ref_q = feat @ w_deq + bias_fused
    assert jnp.allclose(logits, ref_q, atol=2e-4, rtol=2e-2), (
        float(jnp.max(jnp.abs(logits - ref_q))))

    # Reference vs. the true fused f32 weights (validates int8 quantization;
    # error is comparable to the previous bf16-weight path).
    ref = feat @ w_fused + bias_fused
    assert jnp.allclose(logits, ref, atol=2e-3, rtol=8e-2), (
        float(jnp.max(jnp.abs(logits - ref))))

    # --- Tiny-head fallback (single grid step => plain XLA, no kernel cost) ---
    B2, D2, C2 = 2, 32, 16
    feat2 = jax.random.normal(k_feat2, (B2, D2), jnp.float32)
    w2, b2 = make_fc_head_params(k_param2, D2, C2, ifbnneck=False)
    params2 = pack_fc_head_params(w2, b2, num_classes=C2, batch_hint=B2)
    assert not params2["use_pallas"]
    logits2 = fc_head_forward(feat2, params2)
    jax.block_until_ready(logits2)
    assert jnp.allclose(logits2, feat2 @ w2 + b2, atol=1e-5, rtol=1e-5)

    # TODO(synk): training-mode BatchNorm (batch stats), active dropout and the
    # CrossEntropyLabelSmooth loss are training-only paths left to plain JAX.
    print("KERNEL_OK")
</pallas_src>

<mosaic_0001>
module attributes {stable_mosaic.version = 11 : i64} {
  func.func @_fc_head_kernel(%arg0: i32, %arg1: memref<16x128xbf16, #tpu.memory_space<vmem>>, %arg2: memref<128x256xi8, #tpu.memory_space<vmem>>, %arg3: memref<1x256xf32, #tpu.memory_space<vmem>>, %arg4: memref<1x256xf32, #tpu.memory_space<vmem>>, %arg5: memref<8x256xf32, #tpu.memory_space<vmem>>) attributes {dimension_semantics = [#tpu.dimension_semantics<parallel>], iteration_bounds = array<i64: 4>, scalar_prefetch = 0 : i64, scratch_operands = 0 : i64, tpu.core_type = #tpu.core_type<tc>, window_params = [{pipeline_mode = #tpu.pipeline_mode<synchronous>, transform_indices = @transform_0, window_bounds = array<i64: 16, 128>}, {transform_indices = @transform_1, window_bounds = array<i64: 128, 256>}, {transform_indices = @transform_2, window_bounds = array<i64: 1, 256>}, {transform_indices = @transform_3, window_bounds = array<i64: 1, 256>}, {transform_indices = @transform_4, window_bounds = array<i64: 8, 256>}]} {
    %c0 = arith.constant 0 : index
    %c0_0 = arith.constant 0 : index
    %0 = vector.load %arg1[%c0, %c0_0] : memref<16x128xbf16, #tpu.memory_space<vmem>>, vector<16x128xbf16>
    %c0_1 = arith.constant 0 : index
    %c0_2 = arith.constant 0 : index
    %1 = vector.load %arg2[%c0_1, %c0_2] : memref<128x256xi8, #tpu.memory_space<vmem>>, vector<128x256xi8>
    %2 = arith.sitofp %1 : vector<128x256xi8> to vector<128x256xbf16>
    %cst = arith.constant dense<0.000000e+00> : vector<16x256xf32>
    %3 = tpu.matmul %0, %2, %cst {dimension_numbers = #tpu.dot_dimension_numbers<[1], [0], [0], [1], [0, 0, 1, 1], [], []>} : vector<16x128xbf16>, vector<128x256xbf16>, vector<16x256xf32> -> vector<16x256xf32>
    %4 = vector.extract_strided_slice %3 {offsets = [0, 0], sizes = [8, 256], strides = [1, 1]} : vector<16x256xf32> to vector<8x256xf32>
    %c0_3 = arith.constant 0 : index
    %c0_4 = arith.constant 0 : index
    %5 = vector.load %arg3[%c0_3, %c0_4] : memref<1x256xf32, #tpu.memory_space<vmem>>, vector<1x256xf32>
    %6 = vector.broadcast %5 : vector<1x256xf32> to vector<8x256xf32>
    %7 = arith.mulf %4, %6 : vector<8x256xf32>
    %c0_5 = arith.constant 0 : index
    %c0_6 = arith.constant 0 : index
    %8 = vector.load %arg4[%c0_5, %c0_6] : memref<1x256xf32, #tpu.memory_space<vmem>>, vector<1x256xf32>
    %9 = vector.broadcast %8 : vector<1x256xf32> to vector<8x256xf32>
    %10 = arith.addf %7, %9 : vector<8x256xf32>
    %c0_7 = arith.constant 0 : index
    %c0_8 = arith.constant 0 : index
    %11 = vector.load %arg5[%c0_7, %c0_8] : memref<8x256xf32, #tpu.memory_space<vmem>>, vector<8x256xf32>
    tpu.vector_store %arg5[%c0_7, %c0_8], %10 {strides = array<i32>} : memref<8x256xf32, #tpu.memory_space<vmem>>, vector<8x256xf32>,
    return
  }
  func.func @transform_0(%arg0: i32) -> (i32, i32) {
    %c0_i32 = arith.constant 0 : i32
    %c0_i32_0 = arith.constant 0 : i32
    %c0_i32_1 = arith.constant 0 : i32
    return %c0_i32, %c0_i32_0 : i32, i32
  }
  func.func @transform_1(%arg0: i32) -> (i32, i32) {
    %c0_i32 = arith.constant 0 : i32
    %c0_i32_0 = arith.constant 0 : i32
    return %c0_i32, %arg0 : i32, i32
  }
  func.func @transform_2(%arg0: i32) -> (i32, i32) {
    %c0_i32 = arith.constant 0 : i32
    %c0_i32_0 = arith.constant 0 : i32
    return %c0_i32, %arg0 : i32, i32
  }
  func.func @transform_3(%arg0: i32) -> (i32, i32) {
    %c0_i32 = arith.constant 0 : i32
    %c0_i32_0 = arith.constant 0 : i32
    return %c0_i32, %arg0 : i32, i32
  }
  func.func @transform_4(%arg0: i32) -> (i32, i32) {
    %c0_i32 = arith.constant 0 : i32
    %c0_i32_0 = arith.constant 0 : i32
    return %c0_i32, %arg0 : i32, i32
  }
}

</mosaic_0001>

<bundles_post_ra>
// kernel: _fc_head_forward_pallas.1
= control target key start
LH: loop header
LB: loop body
LE: loop exit
PB: predicated region body
PF: predicated region fallthrough
CT: control target
= control target key end

     0   :  { %9 = vsyncpa [#allocation3], 0  ;;  %s845_s0 = inlined_call_operand.vmem [shape: bf16[16,128], index: 0, kind: input, shape index: {}]   ;;  %s846_s1 = inlined_call_operand.hbm [shape: s8[128,1024], index: 1, kind: input, shape index: {}]   ;;  %s847_s2 = inlined_call_operand.vmem [shape: f32[1,1024], index: 2, kind: input, shape index: {}]   ;;  %s848_s3 = inlined_call_operand.vmem [shape: f32[1,1024], index: 3, kind: input, shape index: {}]   ;;  %s849_s4 = inlined_call_operand.hbm [shape: f32[8,1024], index: 4, kind: output, shape index: {}]  }
   0x1   :  { %11 = vsyncpa [#allocation3 + $0x1], 0 }
   0x2   :  { %12 = vsyncpa [#allocation4], 0 }
   0x3   :  { %14 = vsyncpa [#allocation4 + $0x1], 0  ;;  %s701_s15 = smov 0   ;;  %s703_s16 = smov 0  }
   0x4   :  { %s705_s17 = smov 0   ;;  %s707_s18 = smov 0  }
   0x5 LB: > { %s722_s19 = sadd.s32 4294967295, %s671_s18   ;;  %s503_s20 = sadd.s32 4294967294, %s671_s18   ;;  %s671_s18 = sphi %s707_s18, %s858_s18   ;;  %s667_s17 = sphi %s705_s17, %s857_s17   ;;  %s663_s16 = sphi %s703_s16, %s856_s16   ;;  %s659_s15 = sphi %s701_s15, %s855_s15  }
   0x6   : > { %s726_s21 = sadd.s32 1, %s671_s18   ;;  %s48_s22 = sadd.s32 1, %s667_s17 }
   0x7   : > { %s45_s23 = ssub.s32 %s671_s18, %s726_s21  ;;  %p55_p0 = scmp.ne.s32.totalorder %s667_s17, %s663_s16 }
   0x8   : > { %p46_p1 = scmp.eq.s32.totalorder %s45_s23, 0  ;;  %p56_p2 = scmp.eq.s32.totalorder %s671_s18, 0 }
   0x9   : > { %p61_p3 = scmp.ne.s32.totalorder %s663_s16, %s659_s15  ;;  %p62_p4 = scmp.eq.s32.totalorder %s722_s19, 0 }
   0xa   : > { %s738_s24 = scalar_select %p46_p1, %s667_s17, %s48_s22  }
   0xb   : > { %p740_p5 = por %p56_p2, %p55_p0  ;;  %p744_p6 = por %p62_p4, %p61_p3 }
   0xc   : > { %p137_p7 = scmp.eq.s32.totalorder %s722_s19, 3  ;;  %p143_p8 = scmp.eq.s32.totalorder %s503_s20, 3 }
   0xd   : > { %p538_p9 = scmp.lt.s32.totalorder %s671_s18, 4  ;;  %s166_s29 = sand.u32 1, %s667_s17  }
   0xe   : > { %p750_p10 = por %p137_p7, %p55_p0  ;;  %p754_p11 = por %p143_p8, %p61_p3 }
   0xf   : > { %s523_s30 = sshll.u32 %s671_s18, 4  ;;  %s506_s5 = sshll.u32 %s166_s29, 6 }
  0x10   : > { %s175_s8 = scalar_lea.hbm %s846_s1, %s523_s30  ;;  %s170_s10 = scalar_lea.vmem [#allocation2], %s506_s5 }
  0x11   : > { %s176_s9 = sshll.u32 %s175_s8, 4  ;;  %s178_s11 = sshll.u32 %s170_s10, 4  ;;  %s177_s9 = int_to_ptr.hbm [resolvable:$true] %s176_s9  ;;  %s179_s11 = int_to_ptr.vmem [resolvable:$true] %s178_s11 }
  0x12   : > { %p765_p12 = pnand %p538_p9, %p740_p5  ;;  %p509_p13 = scmp.ge.s32.totalorder %s671_s18, 1 }
  0x13   : > { %s167_s13 = scalar_lea.sflag [#allocation3], %s166_s29  ;;  %s575_s14 = sshra.s32 %s177_s9, 4  ;;  %s576_s14 = int_to_ptr.hbm [resolvable:$true] %s575_s14 }
  0x14   : > { %s577_s20 = scalar_lea.hbm %s576_s14, 64  ;;  %p579_p1 = pneg %p765_p12 }
  0x15   : > { %p578_p0 = scmp.ne.s32.totalorder %s576_s14, %s577_s20  ;;  %s582_s30 = scalar_lea.hbm %s846_s1, 256 }
  0x16   : > { %p583_p4 = scmp.lt.s32.totalorder %s576_s14, %s846_s1  ;;  %p584_p5 = scmp.lt.s32.totalorder %s582_s30, %s577_s20 }
  0x17   : > { %p580_p2 = pnand %p579_p1, %p578_p0 }
  0x18   : > { %p585_p7 = por %p584_p5, %p583_p4 }
  0x19   : > { %p581_p3 = pneg %p580_p2 }
  0x1b   : > { %p586_p8 = pnand %p585_p7, %p581_p3 }
  0x1d   : > { %589 = shalt.err (!%p586_p8)
}
  0x1e   : > { %s673_s29 = smov 1024   ;;  %s674_s6 = smov 256  }
  0x1f   : > { %s675_s7 = smov 16   ;;  %p202_p9 = scmp.lt.s32.totalorder %s671_s18, 5 }
  0x20   : > { %533 = dma.hbm_to_vmem [thread:$0]  (!%p765_p12), %s177_s9, 1024, %s179_s11, %s167_s13, %s673_s29, %s674_s6, %s675_s7  }
  0x21   : > { %p203_p0 = pnand %p509_p13, %p202_p9 }
  0x22   : > { %s784_s8 = sand.u32 (!%p203_p0), 1, %s663_s16  }
  0x23   : > { %206 = sbr.rel (%p203_p0) target bundleno = 213 (0xd5), region = 36  ;;  %s510_s10 = sshll.u32 (!%p203_p0), %s784_s8, 6 }
  0x24   : > { %s209_s14 = scalar_lea.sflag (!%p203_p0), [#allocation3], %s784_s8  ;;  %s788_s20 = scalar_lea.vmem (!%p203_p0), [#allocation2], %s510_s10 }
  0x28   : > { %650 = dma.done.wait (%p744_p6), %s209_s14, 1024  }
  0x29   : > { %652 = vsyncadd (%p744_p6), %s209_s14, 4294966272  ;;  %v266_v0 = vld [vmem:[%s788_s20 + $0x30] sm:$0xff]  ;;  %v267_v1 = vld [vmem:[%s788_s20 + $0x38] sm:$0xff]  ;;  %s512_s11 = sshll.u32 %s722_s19, 1  ;;  %s511_s5 = sshll.u32 %s784_s8, 4 }
  0x2a   : > { %v296_v2 = vunpack.c.2.s8 %v266_v0  ;;  %v298_v3 = vunpack.c.3.s8 %v266_v0  ;;  %v297_v4 = vunpack.c.2.s8 %v267_v1  ;;  %v299_v5 = vunpack.c.3.s8 %v267_v1  ;;  %v264_v10 = vld [vmem:[%s788_s20 + $0x20] sm:$0xff]  ;;  %v265_v15 = vld [vmem:[%s788_s20 + $0x28] sm:$0xff]  ;;  %v262_v32 = vld [vmem:[%s788_s20 + $0x10] sm:$0xff]  ;;  %p248_p6 = scmp.lt.s32.totalorder %s512_s11, 7  ;;  %s525_s29 = sshll.u32 %s722_s19, 4 }
  0x2b   : > { %v292_v6 = vunpack.c.0.s8 %v266_v0  ;;  %v294_v7 = vunpack.c.1.s8 %v266_v0  ;;  %v293_v8 = vunpack.c.0.s8 %v267_v1  ;;  %v295_v9 = vunpack.c.1.s8 %v267_v1  ;;  %v263_v37 = vld [vmem:[%s788_s20 + $0x18] sm:$0xff]  ;;  %v260_v54 = vld [vmem:[%s788_s20] sm:$0xff]  ;;  %v261_v59 = vld [vmem:[%s788_s20 + $0x8] sm:$0xff]  ;;  %s410_s10 = scalar_lea.hbm %s849_s4, %s525_s29  ;;  %s245_s14 = scalar_lea.vmem [#allocation5], %s511_s5 }
  0x2c   : > { %v328_v11 = vcvt.s32.f32 %v296_v2  ;;  %v330_v12 = vcvt.s32.f32 %v298_v3  ;;  %v329_v13 = vcvt.s32.f32 %v297_v4  ;;  %v331_v14 = vcvt.s32.f32 %v299_v5  ;;  %s860_s11 = smov (!%p248_p6, %s512_s11), 7  ;;  %s412_s20 = sshll.u32 %s245_s14, 4  ;;  %s413_s20 = int_to_ptr.vmem [resolvable:$true] %s412_s20 }
  0x2d   : > { %v324_v16 = vcvt.s32.f32 %v292_v6  ;;  %v326_v17 = vcvt.s32.f32 %v294_v7  ;;  %v325_v18 = vcvt.s32.f32 %v293_v8  ;;  %v327_v19 = vcvt.s32.f32 %v295_v9  ;;  %s250_s22 = scalar_lea.vmem %s847_s2, %s860_s11  ;;  %s255_s25 = scalar_lea.vmem %s848_s3, %s860_s11 }
  0x2e   : > { %v346_v20 = vpack.c.bf16 %v330_v12, %v328_v11  ;;  %v347_v21 = vpack.c.bf16 %v331_v14, %v329_v13  ;;  %v288_v22 = vunpack.c.2.s8 %v264_v10  ;;  %v290_v23 = vunpack.c.3.s8 %v264_v10  ;;  %s414_s26 = sshll.u32 %s410_s10, 4  ;;  %s399_s19 = scalar_lea.sflag [#allocation4], %s784_s8  ;;  %s415_s26 = int_to_ptr.hbm [resolvable:$true] %s414_s26 }
  0x2f   : > { %v344_v24 = vpack.c.bf16 %v326_v17, %v324_v16  ;;  %v345_v25 = vpack.c.bf16 %v327_v19, %v325_v18  ;;  %v289_v26 = vunpack.c.2.s8 %v265_v15  ;;  %v291_v27 = vunpack.c.3.s8 %v265_v15  ;;  %s619_s9 = sshra.s32 %s415_s26, 4  ;;  %s620_s9 = int_to_ptr.hbm [resolvable:$true] %s619_s9 }
  0x30   : > { %354 = vmatpush.bf16.msra.mxu0 %v346_v20  ;;  %367 = vmatpush.bf16.msra.mxu1 %v347_v21  ;;  %v320_v28 = vcvt.s32.f32 %v288_v22  ;;  %v322_v29 = vcvt.s32.f32 %v290_v23  ;;  %v284_v30 = vunpack.c.0.s8 %v264_v10  ;;  %v286_v31 = vunpack.c.1.s8 %v264_v10  ;;  %s621_s11 = scalar_lea.hbm %s620_s9, 16  ;;  %p626_p2 = scmp.lt.s32.totalorder %s620_s9, %s849_s4 }
  0x31   : > { %v321_v33 = vcvt.s32.f32 %v289_v26  ;;  %v323_v34 = vcvt.s32.f32 %v291_v27  ;;  %v285_v35 = vunpack.c.0.s8 %v265_v15  ;;  %v287_v36 = vunpack.c.1.s8 %v265_v15  ;;  %v388_v26 = vld [vmem:[%s255_s25] sm:$0x3]  ;;  %p622_p12 = scmp.ne.s32.totalorder %s620_s9, %s621_s11 }
  0x32   : > { %v342_v38 = vpack.c.bf16 %v322_v29, %v320_v28  ;;  %v316_v39 = vcvt.s32.f32 %v284_v30  ;;  %v318_v41 = vcvt.s32.f32 %v286_v31  ;;  %v280_v43 = vunpack.c.2.s8 %v262_v32 }
  0x33   : > { %v343_v40 = vpack.c.bf16 %v323_v34, %v321_v33  ;;  %v317_v42 = vcvt.s32.f32 %v285_v35  ;;  %v319_v44 = vcvt.s32.f32 %v287_v36  ;;  %v282_v45 = vunpack.c.3.s8 %v262_v32  ;;  %p623_p13 = pnand %p622_p12, %p750_p10 }
  0x34   : > { %355 = vmatpush.bf16.msra.mxu0 %v344_v24  ;;  %368 = vmatpush.bf16.msra.mxu1 %v345_v25  ;;  %v281_v46 = vunpack.c.2.s8 %v263_v37  ;;  %v283_v47 = vunpack.c.3.s8 %v263_v37  ;;  %v276_v48 = vunpack.c.0.s8 %v262_v32  ;;  %v278_v49 = vunpack.c.1.s8 %v262_v32  ;;  %v524_v24 = vld [vmem:[%s845_s0] sm:$0xff] }
  0x35   : > { %v340_v50 = vpack.c.bf16 %v318_v41, %v316_v39  ;;  %v312_v51 = vcvt.s32.f32 %v280_v43  ;;  %v277_v52 = vunpack.c.0.s8 %v263_v37  ;;  %v279_v53 = vunpack.c.1.s8 %v263_v37  ;;  %v380_v25 = vld [vmem:[%s250_s22] sm:$0x3]  ;;  %p624_p1 = pneg %p623_p13  ;;  %s625_s22 = scalar_lea.hbm %s849_s4, 64 }
  0x36   : > { %v341_v55 = vpack.c.bf16 %v319_v44, %v317_v42  ;;  %v314_v56 = vcvt.s32.f32 %v282_v45  ;;  %v313_v57 = vcvt.s32.f32 %v281_v46  ;;  %v315_v58 = vcvt.s32.f32 %v283_v47  ;;  %p627_p3 = scmp.lt.s32.totalorder %s625_s22, %s621_s11 }
  0x37   : > { %v308_v60 = vcvt.s32.f32 %v276_v48  ;;  %v310_v61 = vcvt.s32.f32 %v278_v49  ;;  %v272_v62 = vunpack.c.2.s8 %v260_v54  ;;  %v309_v63 = vcvt.s32.f32 %v277_v52 }
  0x38   : > { %356 = vmatpush.bf16.msra.mxu0 %v342_v38  ;;  %369 = vmatpush.bf16.msra.mxu1 %v343_v40  ;;  %v311_v0 = vcvt.s32.f32 %v279_v53  ;;  %v274_v1 = vunpack.c.3.s8 %v260_v54  ;;  %v338_v2 = vpack.c.bf16 %v314_v56, %v312_v51  ;;  %v339_v3 = vpack.c.bf16 %v315_v58, %v313_v57  ;;  %p628_p4 = por %p627_p3, %p626_p2 }
  0x39   : > { %v273_v4 = vunpack.c.2.s8 %v261_v59  ;;  %v275_v5 = vunpack.c.3.s8 %v261_v59  ;;  %v336_v6 = vpack.c.bf16 %v310_v61, %v308_v60  ;;  %v304_v7 = vcvt.s32.f32 %v272_v62 }
  0x3a   : > { %v337_v8 = vpack.c.bf16 %v311_v0, %v309_v63  ;;  %v306_v9 = vcvt.s32.f32 %v274_v1  ;;  %v268_v10 = vunpack.c.0.s8 %v260_v54  ;;  %v270_v11 = vunpack.c.1.s8 %v260_v54  ;;  %p629_p5 = pnand %p628_p4, %p624_p1 }
  0x3b   : > { %v305_v12 = vcvt.s32.f32 %v273_v4  ;;  %v307_v13 = vcvt.s32.f32 %v275_v5  ;;  %v269_v14 = vunpack.c.0.s8 %v261_v59  ;;  %v271_v15 = vunpack.c.1.s8 %v261_v59 }
  0x3c   : > { %357 = vmatpush.bf16.msra.mxu0 %v340_v50  ;;  %370 = vmatpush.bf16.msra.mxu1 %v341_v55  ;;  %v334_v16 = vpack.c.bf16 %v306_v9, %v304_v7  ;;  %v300_v17 = vcvt.s32.f32 %v268_v10  ;;  %v302_v19 = vcvt.s32.f32 %v270_v11  ;;  %v382_v27 = vperm.slane %v380_v25, 0 }
  0x3d   : > { %v335_v18 = vpack.c.bf16 %v307_v13, %v305_v12  ;;  %v301_v20 = vcvt.s32.f32 %v269_v14  ;;  %v303_v21 = vcvt.s32.f32 %v271_v15  ;;  %v383_v28 = vperm.slane %v380_v25, 1 }
  0x3e   : > { %v332_v22 = vpack.c.bf16 %v302_v19, %v300_v17  ;;  %v390_v29 = vperm.slane %v388_v26, 0  ;;  %v391_v30 = vperm.slane %v388_v26, 1 }
  0x3f   : > { %v333_v23 = vpack.c.bf16 %v303_v21, %v301_v20 }
  0x40   : > { %358 = vmatpush.bf16.msra.mxu0 %v338_v2  ;;  %371 = vmatpush.bf16.msra.mxu1 %v339_v3 }
  0x44   : > { %359 = vmatpush.bf16.msra.mxu0 %v336_v6  ;;  %372 = vmatpush.bf16.msra.mxu1 %v337_v8 }
  0x48   : > { %360 = vmatpush.bf16.msra.mxu0 %v334_v16  ;;  %373 = vmatpush.bf16.msra.mxu1 %v335_v18 }
  0x4c   : > { %361 = vmatpush.bf16.msra.mxu0 %v332_v22  ;;  %374 = vmatpush.bf16.msra.mxu1 %v333_v23 }
  0x4f   : > { %362 = vmatmul.bf16.vlgmr.msra.gmra.mxu0 %v524_v24  ;;  %375 = vmatmul.bf16.vlgmr.msra.gmra.mxu1 %v524_v24 }
  0xcc   : > { %v363_v31 = vpop.f32.mrf.mxu0  ;;  %v376_v32 = vpop.f32.mrf.mxu1 }
  0xcd   : > { %v386_v33 = vmul.f32 %v382_v27, %v363_v31  ;;  %v387_v34 = vmul.f32 %v383_v28, %v376_v32 }
  0xcf   : > { %v394_v35 = vadd.f32 %v390_v29, %v386_v33  ;;  %v395_v36 = vadd.f32 %v391_v30, %v387_v34 }
  0xd1   : > { %396 = vst [vmem:[%s245_s14] sm:$0xff] %v394_v35 }
  0xd2   : > { %397 = vst [vmem:[%s245_s14 + $0x8] sm:$0xff] %v395_v36 }
  0xd3   : > { %632 = shalt.err (!%p629_p5)
}
  0xd4   : > { %528 = dma.vmem_to_hbm [thread:$0]  (%p750_p10), %s413_s20, 256, %s415_s26, %s399_s19   ;;  %v365_v37 = vpop.f32.mrf.mxu0  ;;  %v378_v38 = vpop.f32.mrf.mxu1 }
  0xd5 PF: > { %p539_p7 = scmp.ge.s32.totalorder %s671_s18, 2  ;;  %s426_s8 = sand.u32 1, %s659_s15  }
  0xd6   : > { %s427_s25 = scalar_lea.sflag [#allocation4], %s426_s8 }
  0xd7   : > { %p535_p8 = pnand %p539_p7, %p754_p11 }
  0xd9   : > { %p536_p9 = pneg %p535_p8 }
  0xdb   : > { %654 = dma.done.wait (%p536_p9), %s427_s25, 256  }
  0xdc   : > { %656 = vsyncadd (%p536_p9), %s427_s25, 4294967040  ;;  %p17_p10 = scmp.ge.s32.totalorder %s726_s21, 6   ;;  %s855_s15 = smov %s663_s16 }
  0xdd   : > { %s856_s16 = smov %s667_s17  ;;  %s857_s17 = smov %s738_s24 }
  0xde   : > { %s858_s18 = smov %s726_s21  ;;  %19 = sbr.rel (!%p17_p10) target bundleno = 5 (0x5), region = 87 }
  0xe3   :  { %433 = vsyncpa [#allocation3], 1 }
  0xe4   :  { %435 = vsyncpa [#allocation3 + $0x1], 1 }
  0xe5   :  { %436 = vsyncpa [#allocation4], 1 }
  0xe6   :  { %438 = vsyncpa [#allocation4 + $0x1], 1 }

</bundles_post_ra>
